<compile_context>
chip_gen: v6e
topology: v6e:2x2x1
jax: 0.10.0
libtpu: 0.0.40
codegen_flags: <defaults>
</compile_context>

<pallas_src>
import functools

import jax
import jax.numpy as jnp
from jax.experimental import pallas as pl
from jax.experimental.pallas import tpu as pltpu


def angle_loss_kernel(cos_ref, tgt_ref, delta_ref, tlogit_ref, out_ref, *, gamma):
    """Per-row A-Softmax loss for one (TILE_N, C) batch tile.

    cos_ref    : (Tn, C) cos_theta tile (upcast to f32 in-kernel)
    tgt_ref    : (Tn, 1) int32 target class per row
    delta_ref  : (Tn, 1) f32   (phi_t - cos_t) / (1 + lamb)   (target-col blend)
    tlogit_ref : (Tn, 1) f32   blended logit at the target column
    out_ref    : (Tn, 1) f32   per-row loss
    """
    cos = cos_ref[...].astype(jnp.float32)
    tgt = tgt_ref[...]
    delta = delta_ref[...]
    tlogit = tlogit_ref[...]
    tn, c = cos.shape

    col = jax.lax.broadcasted_iota(jnp.int32, (tn, c), 1)
    # output == cos_theta everywhere except the target column, where the blend
    # toward phi_theta is added.
    output = cos + jnp.where(col == tgt, delta, 0.0)

    # Row-wise logsumexp (numerically stable); target log-prob is fused:
    #   logpt = output[i, target[i]] - lse[i] == tlogit - lse
    m = jnp.max(output, axis=1, keepdims=True)
    s = jnp.sum(jnp.exp(output - m), axis=1, keepdims=True)
    lse = m + jnp.log(s)
    logpt = tlogit - lse

    if gamma == 0.0:
        # (1 - pt)**0 == 1 -> skip exp/pow entirely (module default).
        loss = -logpt
    else:
        pt = jnp.minimum(jnp.exp(logpt), 1.0)  # guard pt > 1 from rounding
        loss = -((1.0 - pt) ** gamma) * logpt

    out_ref[...] = loss


def _pick_tile_n(n, c, itemsize):
    """Batch tile: big enough to pipeline, small enough for v7x's 64 MiB VMEM."""
    budget = 8 * 1024 * 1024  # bytes allowed for the double-buffered cos block
    max_rows = max(8, budget // max(1, 2 * c * itemsize))
    tile = min(512, n, max_rows)
    if tile < n:
        tile = max(8, (tile // 8) * 8)  # multiple of 8 sublanes for partial tiles
    return tile


def angle_loss(cos_theta, phi_theta, target, *, gamma=0, it=1,
               lambda_min=5.0, lambda_max=1500.0):
    """Pallas wrapper. cos_theta/phi_theta: (N, C) float, target: (N,) int."""
    n, c = cos_theta.shape
    lamb = max(lambda_min, lambda_max / (1.0 + 0.1 * it))
    inv_one_plus_lamb = 1.0 / (1.0 + lamb)

    tgt2d = target.reshape(n, 1).astype(jnp.int32)

    # Only phi[i, target[i]] / cos[i, target[i]] are needed beyond the softmax
    # over cos, so gather them to (N, 1) columns in the wrapper; the full
    # phi_theta matrix is never streamed through the kernel.
    cos_t = jnp.take_along_axis(cos_theta, tgt2d, axis=1).astype(jnp.float32)
    phi_t = jnp.take_along_axis(phi_theta, tgt2d, axis=1).astype(jnp.float32)
    delta = (phi_t - cos_t) * inv_one_plus_lamb   # added at the target column
    tlogit = cos_t + delta                        # blended target logit

    itemsize = jnp.dtype(cos_theta.dtype).itemsize
    tile_n = _pick_tile_n(n, c, itemsize)
    grid = (pl.cdiv(n, tile_n),)

    kernel = functools.partial(angle_loss_kernel, gamma=float(gamma))

    cost = pl.CostEstimate(
        flops=6 * n * c,
        transcendentals=n * c + n,
        bytes_accessed=n * c * itemsize + 4 * n * 4,
    )

    per_row = pl.pallas_call(
        kernel,
        out_shape=jax.ShapeDtypeStruct((n, 1), jnp.float32),
        grid_spec=pltpu.PrefetchScalarGridSpec(
            num_scalar_prefetch=0,
            grid=grid,
            in_specs=[
                pl.BlockSpec((tile_n, c), lambda i: (i, 0)),   # cos_theta tile
                pl.BlockSpec((tile_n, 1), lambda i: (i, 0)),   # target column
                pl.BlockSpec((tile_n, 1), lambda i: (i, 0)),   # delta column
                pl.BlockSpec((tile_n, 1), lambda i: (i, 0)),   # target logit column
            ],
            out_specs=pl.BlockSpec((tile_n, 1), lambda i: (i, 0)),
        ),
        compiler_params=pltpu.CompilerParams(
            dimension_semantics=("parallel",),
            vmem_limit_bytes=32 * 1024 * 1024,
        ),
        cost_estimate=cost,
    )(cos_theta, tgt2d, delta, tlogit)

    # TODO(synk): for very large C (10k+ classes), add a second ("arbitrary")
    # grid axis over C with an online-softmax accumulator instead of a single
    # full-width class block.
    return jnp.mean(per_row)


def angle_loss_ref(cos_theta, phi_theta, target, *, gamma=0, it=1,
                   lambda_min=5.0, lambda_max=1500.0):
    """Pure-JAX reference for verification."""
    n, c = cos_theta.shape
    lamb = max(lambda_min, lambda_max / (1.0 + 0.1 * it))
    mask = jax.nn.one_hot(target, c, dtype=jnp.float32)
    output = cos_theta + mask * (phi_theta - cos_theta) / (1.0 + lamb)
    logp = jax.nn.log_softmax(output, axis=1)
    logpt = jnp.sum(mask * logp, axis=1)
    pt = jnp.exp(logpt)
    return jnp.mean(-((1.0 - pt) ** gamma) * logpt)


if __name__ == "__main__":
    key = jax.random.PRNGKey(0)
    k1, k2, k3 = jax.random.split(key, 3)

    N, C = 8, 16  # small batch, small number of classes
    cos_theta = jax.random.normal(k1, (N, C), dtype=jnp.float32)
    phi_theta = jax.random.normal(k2, (N, C), dtype=jnp.float32)
    target = jax.random.randint(k3, (N,), 0, C, dtype=jnp.int32)

    loss = angle_loss(cos_theta, phi_theta, target, gamma=0, it=1)
    jax.block_until_ready(loss)

    ref = angle_loss_ref(cos_theta, phi_theta, target, gamma=0, it=1)
    assert jnp.allclose(loss, ref, rtol=1e-5, atol=1e-5), (loss, ref)

    print("KERNEL_OK")
</pallas_src>

<mosaic_0001>
module attributes {stable_mosaic.version = 11 : i64} {
  func.func @angle_loss_kernel(%arg0: i32, %arg1: memref<8x16xf32, #tpu.memory_space<vmem>>, %arg2: memref<8x1xi32, #tpu.memory_space<vmem>>, %arg3: memref<8x1xf32, #tpu.memory_space<vmem>>, %arg4: memref<8x1xf32, #tpu.memory_space<vmem>>, %arg5: memref<8x1xf32, #tpu.memory_space<vmem>>) attributes {dimension_semantics = [#tpu.dimension_semantics<parallel>], iteration_bounds = array<i64: 1>, scalar_prefetch = 0 : i64, scratch_operands = 0 : i64, tpu.core_type = #tpu.core_type<tc>, window_params = [{transform_indices = @transform_0, window_bounds = array<i64: 8, 16>}, {transform_indices = @transform_1, window_bounds = array<i64: 8, 1>}, {transform_indices = @transform_2, window_bounds = array<i64: 8, 1>}, {transform_indices = @transform_3, window_bounds = array<i64: 8, 1>}, {transform_indices = @transform_4, window_bounds = array<i64: 8, 1>}]} {
    %c0 = arith.constant 0 : index
    %c0_0 = arith.constant 0 : index
    %0 = vector.load %arg1[%c0, %c0_0] : memref<8x16xf32, #tpu.memory_space<vmem>>, vector<8x16xf32>
    %c0_1 = arith.constant 0 : index
    %c0_2 = arith.constant 0 : index
    %1 = vector.load %arg2[%c0_1, %c0_2] : memref<8x1xi32, #tpu.memory_space<vmem>>, vector<8x1xi32>
    %c0_3 = arith.constant 0 : index
    %c0_4 = arith.constant 0 : index
    %2 = vector.load %arg3[%c0_3, %c0_4] : memref<8x1xf32, #tpu.memory_space<vmem>>, vector<8x1xf32>
    %c0_5 = arith.constant 0 : index
    %c0_6 = arith.constant 0 : index
    %3 = vector.load %arg4[%c0_5, %c0_6] : memref<8x1xf32, #tpu.memory_space<vmem>>, vector<8x1xf32>
    %4 = tpu.iota {dimensions = array<i32: 1>} : vector<8x16xi32>
    %5 = vector.broadcast %1 : vector<8x1xi32> to vector<8x16xi32>
    %6 = arith.cmpi eq, %4, %5 : vector<8x16xi32>
    %cst = arith.constant 0.000000e+00 : f32
    %7 = vector.shape_cast %2 : vector<8x1xf32> to vector<8x1xf32>
    %8 = vector.broadcast %7 : vector<8x1xf32> to vector<8x16xf32>
    %9 = vector.broadcast %cst : f32 to vector<8x16xf32>
    %10 = arith.select %6, %8, %9 : vector<8x16xi1>, vector<8x16xf32>
    %11 = arith.addf %0, %10 : vector<8x16xf32>
    %cst_7 = arith.constant dense<0xFF800000> : vector<8xf32>
    %12 = vector.multi_reduction <maximumf>, %11, %cst_7 [1] : vector<8x16xf32> to vector<8xf32>
    %13 = vector.shape_cast %12 : vector<8xf32> to vector<8x1xf32>
    %14 = vector.broadcast %13 : vector<8x1xf32> to vector<8x16xf32>
    %15 = arith.subf %11, %14 : vector<8x16xf32>
    %16 = math.exp %15 : vector<8x16xf32>
    %cst_8 = arith.constant dense<0.000000e+00> : vector<8xf32>
    %17 = vector.multi_reduction <add>, %16, %cst_8 [1] : vector<8x16xf32> to vector<8xf32>
    %18 = vector.shape_cast %17 : vector<8xf32> to vector<8x1xf32>
    %19 = math.log %18 : vector<8x1xf32>
    %20 = arith.addf %13, %19 : vector<8x1xf32>
    %21 = arith.subf %3, %20 : vector<8x1xf32>
    %cst_9 = arith.constant 0.000000e+00 : f32
    %22 = vector.broadcast %cst_9 : f32 to vector<8x1xf32>
    %23 = arith.subf %22, %21 : vector<8x1xf32>
    %c0_10 = arith.constant 0 : index
    %c0_11 = arith.constant 0 : index
    %24 = vector.load %arg5[%c0_10, %c0_11] : memref<8x1xf32, #tpu.memory_space<vmem>>, vector<8x1xf32>
    tpu.vector_store %arg5[%c0_10, %c0_11], %23 {strides = array<i32>} : memref<8x1xf32, #tpu.memory_space<vmem>>, vector<8x1xf32>,
    return
  }
  func.func @transform_0(%arg0: i32) -> (i32, i32) {
    %c0_i32 = arith.constant 0 : i32
    %c0_i32_0 = arith.constant 0 : i32
    return %arg0, %c0_i32 : i32, i32
  }
  func.func @transform_1(%arg0: i32) -> (i32, i32) {
    %c0_i32 = arith.constant 0 : i32
    %c0_i32_0 = arith.constant 0 : i32
    return %arg0, %c0_i32 : i32, i32
  }
  func.func @transform_2(%arg0: i32) -> (i32, i32) {
    %c0_i32 = arith.constant 0 : i32
    %c0_i32_0 = arith.constant 0 : i32
    return %arg0, %c0_i32 : i32, i32
  }
  func.func @transform_3(%arg0: i32) -> (i32, i32) {
    %c0_i32 = arith.constant 0 : i32
    %c0_i32_0 = arith.constant 0 : i32
    return %arg0, %c0_i32 : i32, i32
  }
  func.func @transform_4(%arg0: i32) -> (i32, i32) {
    %c0_i32 = arith.constant 0 : i32
    %c0_i32_0 = arith.constant 0 : i32
    return %arg0, %c0_i32 : i32, i32
  }
}

</mosaic_0001>

<bundles_post_ra>
// kernel: tpu_custom_call.1
= control target key start
LH: loop header
LB: loop body
LE: loop exit
PB: predicated region body
PF: predicated region fallthrough
CT: control target
= control target key end

     0   :  { %v61_v0 = vmov 0   ;;  %v21_v3 = vlaneseq  ;;  %vm34_vm1 = vcmask 130048   ;;  %vm49_vm2 = vcmask 7168   ;;  %s102_s1 = inlined_call_operand.vmem [shape: s32[8,1], index: 1, kind: input, shape index: {}]   ;;  %s103_s2 = inlined_call_operand.vmem [shape: f32[8,1], index: 2, kind: input, shape index: {}]   ;;  %s104_s0 = inlined_call_operand.vmem [shape: f32[8,16], index: 0, kind: input, shape index: {}]   ;;  %s105_s3 = inlined_call_operand.vmem [shape: f32[8,1], index: 3, kind: input, shape index: {}]   ;;  %s106_s4 = inlined_call_operand.vmem [shape: f32[8,1], index: 4, kind: output, shape index: {}]  }
   0x1   :  { %56 = vset.pattern.permute.xlu0 %v61_v0  ;;  %v18_v1 = vld [vmem:[%s102_s1] sm:$0xff] }
   0x2   :  { %24 = vperm.xlu0 %56, %v18_v1   ;;  %v19_v2 = vld [vmem:[%s103_s2] sm:$0xff]  ;;  %v22_v4 = vand.u32 127, %v21_v3 }
   0x3   :  { %v17_v6 = vld [vmem:[%s104_s0] sm:$0xff] }
   0x4   :  { %v20_v19 = vld [vmem:[%s105_s3] sm:$0xff] }
   0x6   :  { %29 = vperm.xlu0 %56, %v19_v2  }
  0x7d   :  { %v25_v5 = vpop.permute.xlu0 %24 }
  0x7e   :  { %vm26_vm0 = vcmp.eq.s32.totalorder %v22_v4, %v25_v5 }
  0x81   :  { %v30_v7 = vpop.permute.xlu0 %29 }
  0x82   :  { %v32_v8 = vsel %vm26_vm0, %v30_v7, 0.0 }
  0x83   :  { %v33_v9 = vadd.f32 %v32_v8, %v17_v6 }
  0x85   :  { %v35_v10 = vsel %vm34_vm1, %v33_v9, -inf }
  0x86   :  { %36 = vmax.xlane.f32.xlu1 %v35_v10 }
 0x10f   :  { %v37_v11 = vpop.xlane.xlu1 %36 }
 0x110   :  { %v38_v12 = vsub.f32 %v33_v9, %v37_v11 }
 0x112   :  { %v39_v13 = vmul.f32 1.442695, %v38_v12 }
 0x114   :  { %57 = vpow2.f32 %v39_v13 }
 0x121   :  { %v58_v14 = vpop.eup %57 }
 0x122   :  { %v41_v15 = vsel %vm34_vm1, %v58_v14, 0.0 }
 0x123   :  { %42 = vadd.xlane.f32.xlu1 %v41_v15 }
 0x1ac   :  { %v43_v16 = vpop.xlane.xlu1 %42 }
 0x1ad   :  { %59 = vlog2.f32 %v43_v16 }
 0x1ba   :  { %v60_v17 = vpop.eup %59 }
 0x1bb   :  { %v45_v18 = vmul.f32 0.6931472, %v60_v17 }
 0x1bd   :  { %v46_v20 = vadd.f32 %v45_v18, %v37_v11 }
 0x1bf   :  { %v47_v21 = vsub.f32 %v20_v19, %v46_v20 }
 0x1c1   :  { %v48_v22 = vsub.f32 0.0, %v47_v21 }
 0x1c3   :  { %50 = vst.msk [vmem:[%s106_s4] sm:$0xff] %vm49_vm2, %v48_v22 }

</bundles_post_ra>
